<compile_context>
chip_gen: v7x
topology: tpu7x:2x2x1
jax: 0.10.0
libtpu: 0.0.40
codegen_flags: <defaults>
</compile_context>

<pallas_src>
import functools

import numpy as np

import jax
import jax.numpy as jnp
from jax.experimental import pallas as pl
from jax.experimental.pallas import tpu as pltpu

_F32 = jnp.float32
_BF16 = jnp.bfloat16


# --------------------------------------------------------------------------
# In-kernel math
# --------------------------------------------------------------------------
def _erf_f32(z):
    """Abramowitz & Stegun 7.1.26 rational approximation, |err| ~1.5e-7.

    The reciprocal is evaluated with the EUP approximate reciprocal plus one
    Newton-Raphson step (rel err ~ eps^2), so the divide leaves the VALU.
    """
    p = 0.3275911
    a1, a2, a3, a4, a5 = (0.254829592, -0.284496736, 1.421413741,
                          -1.453152027, 1.061405429)
    az = jnp.abs(z)
    d = 1.0 + p * az
    t = pl.reciprocal(d, approx=True)
    t = t * (2.0 - d * t)                       # one NR refinement step
    poly = ((((a5 * t + a4) * t + a3) * t + a2) * t + a1) * t
    e = poly * jnp.exp(-az * az)
    return jnp.where(z >= 0, 1.0 - e, e - 1.0)


def _gelu_exact(x):
    # Matches PyTorch nn.GELU() default (erf form), evaluated in f32.
    # TODO(synk): on v6e/v7x the polynomial could run in bf16 (bf16 VALU/EUP);
    # kept f32 so the identical kernel stays correct on v5e.
    return 0.5 * x * (1.0 + _erf_f32(x * 0.7071067811865476))


def _mlp_kernel(x_ref, w1_ref, b1_ref, w2_ref, b2_ref, o_ref, acc_ref):
    # Grid: (row tiles ["parallel"], F chunks ["arbitrary" reduction, last]).
    #   x_ref:  (tm, E)   activation rows (same block across all F chunks)
    #   w1_ref: (E, tf)   lin1 weight chunk, bf16, x @ W layout
    #   b1_ref: (1, tf)   f32
    #   w2_ref: (tf, E)   lin2 weight chunk, bf16
    #   b2_ref: (1, E)    f32
    #   o_ref:  (tm, E)   written on the last F chunk only
    #   acc_ref:(tm, E)   f32 accumulator scratch
    k = pl.program_id(1)

    @pl.when(k == 0)
    def _init():
        acc_ref[...] = jnp.zeros_like(acc_ref)

    x = x_ref[...].astype(_BF16)                       # bf16 MXU operand
    h = jnp.dot(x, w1_ref[...], preferred_element_type=_F32)
    h = _gelu_exact(h + b1_ref[...])
    # Deliberate bf16 downcast of the hidden activations: keeps the second
    # matmul on the bf16-native MXU path (f32 matmuls cost ~3x and 2x VMEM).
    acc_ref[...] += jnp.dot(h.astype(_BF16), w2_ref[...],
                            preferred_element_type=_F32)

    @pl.when(k == pl.num_programs(1) - 1)
    def _finalize():
        o_ref[...] = (acc_ref[...] + b2_ref[...]).astype(o_ref.dtype)


# --------------------------------------------------------------------------
# Tiling / VMEM planning
# --------------------------------------------------------------------------
@functools.lru_cache(maxsize=None)
def _vmem_budget_limit():
    """Per-generation VMEM budget/limit (v5e/v6e ~92/109 MiB, v7x ~46/54 MiB)."""
    cap = None
    try:
        cap = getattr(pltpu.get_tpu_info(), "vmem_capacity_bytes", None)
    except Exception:
        cap = None
    if not cap:
        cap = 64 * 1024 * 1024          # conservative fallback: v7x per-TC VMEM
    return int(cap * 0.72), int(cap * 0.85)


def _align_rows(tm):
    # MXU-friendly row tiles: multiples of 256 when possible (2x256^2 MXU on
    # v6e/v7x, also fine on v5e's 4x128^2), otherwise multiples of 8 (sublane).
    if tm >= 256:
        return (tm // 256) * 256
    return max(8, (tm // 8) * 8)


def _choose_tiles(M, E, F, act_itemsize, budget_bytes):
    """Pick (row tile tm, F chunk tf). tf == F means fully-resident weights."""
    budget = int(budget_bytes / 1.15)   # headroom: Mosaic scratch / hidden temps

    def weight_bytes(tf, nbuf):
        # bf16 W1 chunk + bf16 W2 chunk + f32 b1 chunk (nbuf buffers) + f32 b2.
        return nbuf * (2 * E * tf * 2 + tf * 4) + E * 4

    def per_row_bytes(tf):
        # x/out tiles double-buffered + f32 accumulator + in-kernel bf16 copy
        # of x + f32 hidden + bf16 hidden copy + one extra f32 GELU temp.
        return E * (4 * act_itemsize + 4 + 2) + tf * (4 + 2 + 4)

    # ---- Path 1: full-F weights resident in VMEM (single-buffered). ----
    avail = budget - weight_bytes(F, 1)
    tm_cap = avail // per_row_bytes(F) if avail > 0 else 0
    if tm_cap >= min(M, 256):
        if M <= min(tm_cap, 512):
            # Whole row range in one block.
            # TODO(synk): on v7x (2 TensorCores) mid-size M should be split in
            # two row blocks so the "parallel" axis can shard across cores.
            return M, F
        return _align_rows(min(tm_cap, 512)), F

    # ---- Path 2: weights exceed this chip's VMEM (e.g. big MLPs on v7x's ----
    # 64 MiB): stream double-buffered F chunks over a reduction grid axis.
    tm = M if M <= 256 else 256
    if tm < M:
        tm = max(8, (tm // 8) * 8)
    if F % 128 == 0:
        tf = None
        for cand in range(F - 128, 0, -128):
            if F % cand:
                continue                         # chunk must divide F exactly
            if weight_bytes(cand, 2) + tm * per_row_bytes(cand) <= budget:
                tf = cand
                break
        if tf is None:
            tf = 128                             # best effort: smallest chunk
    else:
        # TODO(synk): zero-pad F to a multiple of 128 so a misaligned mlp_dim
        # can also be chunked; fall back to resident full-F weights for now.
        tf = F
    while tm > 8 and weight_bytes(tf, 2) + tm * per_row_bytes(tf) > budget:
        tm = max(8, (tm // 2 // 8) * 8)
    return tm, tf


# --------------------------------------------------------------------------
# pallas_call construction
# --------------------------------------------------------------------------
def _build_call(M, E, F, tm, tf, act_dtype, limit_bytes, single_buffer_resident):
    grid = (pl.cdiv(M, tm), pl.cdiv(F, tf))
    resident_weights = (tf == F)

    def const_spec(shape):
        # Constant index_map -> DMA'd once; single-buffering it just saves VMEM.
        if single_buffer_resident:
            return pl.BlockSpec(shape, lambda i, k: (0, 0),
                                pipeline_mode=pl.Buffered(1))
        return pl.BlockSpec(shape, lambda i, k: (0, 0))

    if resident_weights:
        w1_spec = const_spec((E, F))
        b1_spec = const_spec((1, F))
        w2_spec = const_spec((F, E))
    else:
        # Streamed F chunks: default double-buffering overlaps the DMA of
        # chunk k+1 with GELU + second matmul of chunk k.
        w1_spec = pl.BlockSpec((E, tf), lambda i, k: (0, k))
        b1_spec = pl.BlockSpec((1, tf), lambda i, k: (0, k))
        w2_spec = pl.BlockSpec((tf, E), lambda i, k: (k, 0))
    b2_spec = const_spec((1, E))

    return pl.pallas_call(
        _mlp_kernel,
        out_shape=jax.ShapeDtypeStruct((M, E), act_dtype),
        grid_spec=pltpu.PrefetchScalarGridSpec(
            num_scalar_prefetch=0,
            grid=grid,
            in_specs=[
                pl.BlockSpec((tm, E), lambda i, k: (i, 0)),   # streamed rows
                w1_spec, b1_spec, w2_spec, b2_spec,
            ],
            out_specs=pl.BlockSpec((tm, E), lambda i, k: (i, 0)),
            scratch_shapes=[pltpu.VMEM((tm, E), jnp.float32)],
        ),
        compiler_params=pltpu.CompilerParams(
            dimension_semantics=("parallel", "arbitrary"),
            vmem_limit_bytes=int(limit_bytes),
        ),
    )


def prepare_mlp_params(w1, b1, w2, b2):
    """One-time weight prep: transpose to x @ W layout and cast to bf16.

    For frozen inference weights call this once outside the hot path so the
    per-call transpose/cast HBM round-trip is not paid on every invocation.
    """
    F, E = w1.shape
    assert w2.shape == (E, F) and b1.shape == (F,) and b2.shape == (E,)
    w1t = jnp.transpose(w1).astype(_BF16)       # (E, F)
    w2t = jnp.transpose(w2).astype(_BF16)       # (F, E)
    b1r = b1.reshape(1, F).astype(_F32)
    b2r = b2.reshape(1, E).astype(_F32)
    return w1t, b1r, w2t, b2r


def mlp_block(x, w1, b1, w2, b2, *, prepared=False):
    """Fused MLPBlock forward: lin2(GELU(lin1(x))).

    x:  (..., E)
    w1: (F, E), b1: (F,)   -- PyTorch nn.Linear(E, F) layout
    w2: (E, F), b2: (E,)   -- PyTorch nn.Linear(F, E) layout
    If prepared=True, (w1, b1, w2, b2) are outputs of prepare_mlp_params.

    Numerics: matmuls use bf16 operands with f32 accumulation (MXU-native on
    v5e/v6e/v7x); the hidden activations are deliberately downcast to bf16
    between the two matmuls.  GELU is the exact erf form, evaluated in f32.
    """
    if prepared:
        w1t, b1r, w2t, b2r = w1, b1, w2, b2
    else:
        w1t, b1r, w2t, b2r = prepare_mlp_params(w1, b1, w2, b2)
    E, F = w1t.shape

    orig_shape = x.shape
    assert orig_shape[-1] == E
    M = int(np.prod(orig_shape[:-1]))
    x2 = x.reshape(M, E)

    budget, limit = _vmem_budget_limit()
    tm, tf = _choose_tiles(M, E, F, jnp.dtype(x.dtype).itemsize, budget)

    args = (x2, w1t, b1r, w2t, b2r)
    try:
        out = _build_call(M, E, F, tm, tf, x.dtype, limit, True)(*args)
    except Exception:
        # Fallback for JAX versions without BlockSpec(pipeline_mode=...):
        # default double-buffered resident weights (costs VMEM, stays correct).
        out = _build_call(M, E, F, tm, tf, x.dtype, limit, False)(*args)

    return out.reshape(orig_shape)


def mlp_block_ref(x, w1, b1, w2, b2):
    """Pure-JAX f32 reference mirroring the PyTorch forward (exact erf GELU)."""
    hp = jax.lax.Precision.HIGHEST
    h = jnp.dot(x, w1.T, precision=hp) + b1
    h = jax.nn.gelu(h, approximate=False)
    return jnp.dot(h, w2.T, precision=hp) + b2


if __name__ == "__main__":
    key = jax.random.PRNGKey(0)
    kx, k1, k2, k3, k4 = jax.random.split(key, 5)

    B, N, E, F = 2, 8, 32, 64   # batch, seq, embedding_dim, mlp_dim

    def q(a):   # bf16-representable f32: keeps the bf16 MXU path comparable
        return a.astype(jnp.bfloat16).astype(jnp.float32)

    x = q(jax.random.normal(kx, (B, N, E), dtype=jnp.float32))
    w1 = q(jax.random.normal(k1, (F, E), dtype=jnp.float32) / np.sqrt(E))
    b1 = q(jax.random.normal(k2, (F,), dtype=jnp.float32) * 0.1)
    w2 = q(jax.random.normal(k3, (E, F), dtype=jnp.float32) / np.sqrt(F))
    b2 = q(jax.random.normal(k4, (E,), dtype=jnp.float32) * 0.1)

    out = jax.block_until_ready(mlp_block(x, w1, b1, w2, b2))
    assert out.shape == (B, N, E) and out.dtype == x.dtype

    ref = mlp_block_ref(x, w1, b1, w2, b2)
    err = jnp.abs(out - ref)
    max_err = float(jnp.max(err))
    mean_err = float(jnp.mean(err))
    # Tolerance reflects the deliberate bf16 downcast of the hidden
    # activations between the two matmuls (bf16 ulp ~1e-2 at |h|~3, averaged
    # down by the 64-term second matmul); all other steps match the f32 ref.
    assert jnp.allclose(out, ref, atol=2e-2, rtol=2e-2), f"max_err={max_err}"
    assert mean_err < 3e-3, f"mean_err={mean_err}"

    print("KERNEL_OK")
</pallas_src>

<mosaic_0001>
module attributes {stable_mosaic.version = 11 : i64} {
  func.func @_mlp_kernel(%arg0: i32, %arg1: i32, %arg2: memref<16x32xf32, #tpu.memory_space<vmem>>, %arg3: memref<32x64xbf16, #tpu.memory_space<vmem>>, %arg4: memref<1x64xf32, #tpu.memory_space<vmem>>, %arg5: memref<64x32xbf16, #tpu.memory_space<vmem>>, %arg6: memref<1x32xf32, #tpu.memory_space<vmem>>, %arg7: memref<16x32xf32, #tpu.memory_space<vmem>>, %arg8: memref<16x32xf32, #tpu.memory_space<vmem>>) attributes {dimension_semantics = [#tpu.dimension_semantics<parallel>, #tpu.dimension_semantics<arbitrary>], iteration_bounds = array<i64: 1, 1>, scalar_prefetch = 0 : i64, scratch_operands = 1 : i64, tpu.core_type = #tpu.core_type<tc>, window_params = [{transform_indices = @transform_0, window_bounds = array<i64: 16, 32>}, {pipeline_mode = #tpu.pipeline_mode<synchronous>, transform_indices = @transform_1, window_bounds = array<i64: 32, 64>}, {pipeline_mode = #tpu.pipeline_mode<synchronous>, transform_indices = @transform_2, window_bounds = array<i64: 1, 64>}, {pipeline_mode = #tpu.pipeline_mode<synchronous>, transform_indices = @transform_3, window_bounds = array<i64: 64, 32>}, {pipeline_mode = #tpu.pipeline_mode<synchronous>, transform_indices = @transform_4, window_bounds = array<i64: 1, 32>}, {transform_indices = @transform_5, window_bounds = array<i64: 16, 32>}]} {
    %c0_i32 = arith.constant 0 : i32
    %0 = arith.cmpi eq, %arg1, %c0_i32 : i32
    %1 = arith.extui %0 : i1 to i32
    %c0_i32_0 = arith.constant 0 : i32
    %2 = arith.cmpi ne, %1, %c0_i32_0 : i32
    scf.if %2 {
      %cst_30 = arith.constant 0.000000e+00 : f32
      %62 = vector.broadcast %cst_30 : f32 to vector<16x32xf32>
      %c0_31 = arith.constant 0 : index
      %c0_32 = arith.constant 0 : index
      %63 = vector.load %arg8[%c0_31, %c0_32] : memref<16x32xf32, #tpu.memory_space<vmem>>, vector<16x32xf32>
      tpu.vector_store %arg8[%c0_31, %c0_32], %62 {strides = array<i32>} : memref<16x32xf32, #tpu.memory_space<vmem>>, vector<16x32xf32>,
    } else {
    }
    %c0 = arith.constant 0 : index
    %c0_1 = arith.constant 0 : index
    %3 = vector.load %arg2[%c0, %c0_1] : memref<16x32xf32, #tpu.memory_space<vmem>>, vector<16x32xf32>
    %4 = arith.truncf %3 : vector<16x32xf32> to vector<16x32xbf16>
    %c0_2 = arith.constant 0 : index
    %c0_3 = arith.constant 0 : index
    %5 = vector.load %arg3[%c0_2, %c0_3] : memref<32x64xbf16, #tpu.memory_space<vmem>>, vector<32x64xbf16>
    %cst = arith.constant dense<0.000000e+00> : vector<16x64xf32>
    %6 = tpu.matmul %4, %5, %cst {dimension_numbers = #tpu.dot_dimension_numbers<[1], [0], [0], [1], [0, 0, 1, 1], [], []>} : vector<16x32xbf16>, vector<32x64xbf16>, vector<16x64xf32> -> vector<16x64xf32>
    %c0_4 = arith.constant 0 : index
    %c0_5 = arith.constant 0 : index
    %7 = vector.load %arg4[%c0_4, %c0_5] : memref<1x64xf32, #tpu.memory_space<vmem>>, vector<1x64xf32>
    %8 = vector.broadcast %7 : vector<1x64xf32> to vector<16x64xf32>
    %9 = arith.addf %6, %8 : vector<16x64xf32>
    %cst_6 = arith.constant 5.000000e-01 : f32
    %10 = vector.broadcast %cst_6 : f32 to vector<16x64xf32>
    %11 = arith.mulf %10, %9 : vector<16x64xf32>
    %cst_7 = arith.constant 0.707106769 : f32
    %12 = vector.broadcast %cst_7 : f32 to vector<16x64xf32>
    %13 = arith.mulf %9, %12 : vector<16x64xf32>
    %14 = math.absf %13 : vector<16x64xf32>
    %cst_8 = arith.constant 0.327591091 : f32
    %15 = vector.broadcast %cst_8 : f32 to vector<16x64xf32>
    %16 = arith.mulf %15, %14 : vector<16x64xf32>
    %cst_9 = arith.constant 1.000000e+00 : f32
    %17 = vector.broadcast %cst_9 : f32 to vector<16x64xf32>
    %18 = arith.addf %17, %16 : vector<16x64xf32>
    %19 = tpu.reciprocal %18 {approx = true} : vector<16x64xf32> -> vector<16x64xf32>
    %20 = arith.mulf %18, %19 : vector<16x64xf32>
    %cst_10 = arith.constant 2.000000e+00 : f32
    %21 = vector.broadcast %cst_10 : f32 to vector<16x64xf32>
    %22 = arith.subf %21, %20 : vector<16x64xf32>
    %23 = arith.mulf %19, %22 : vector<16x64xf32>
    %cst_11 = arith.constant 1.06140542 : f32
    %24 = vector.broadcast %cst_11 : f32 to vector<16x64xf32>
    %25 = arith.mulf %24, %23 : vector<16x64xf32>
    %cst_12 = arith.constant -1.45315206 : f32
    %26 = vector.broadcast %cst_12 : f32 to vector<16x64xf32>
    %27 = arith.addf %25, %26 : vector<16x64xf32>
    %28 = arith.mulf %27, %23 : vector<16x64xf32>
    %cst_13 = arith.constant 1.42141378 : f32
    %29 = vector.broadcast %cst_13 : f32 to vector<16x64xf32>
    %30 = arith.addf %28, %29 : vector<16x64xf32>
    %31 = arith.mulf %30, %23 : vector<16x64xf32>
    %cst_14 = arith.constant -0.284496725 : f32
    %32 = vector.broadcast %cst_14 : f32 to vector<16x64xf32>
    %33 = arith.addf %31, %32 : vector<16x64xf32>
    %34 = arith.mulf %33, %23 : vector<16x64xf32>
    %cst_15 = arith.constant 0.254829586 : f32
    %35 = vector.broadcast %cst_15 : f32 to vector<16x64xf32>
    %36 = arith.addf %34, %35 : vector<16x64xf32>
    %37 = arith.mulf %36, %23 : vector<16x64xf32>
    %cst_16 = arith.constant 0.000000e+00 : f32
    %38 = vector.broadcast %cst_16 : f32 to vector<16x64xf32>
    %39 = arith.subf %38, %14 : vector<16x64xf32>
    %40 = arith.mulf %39, %14 : vector<16x64xf32>
    %41 = math.exp %40 : vector<16x64xf32>
    %42 = arith.mulf %37, %41 : vector<16x64xf32>
    %cst_17 = arith.constant 0.000000e+00 : f32
    %43 = vector.broadcast %cst_17 : f32 to vector<16x64xf32>
    %44 = arith.cmpf oge, %13, %43 : vector<16x64xf32>
    %cst_18 = arith.constant 1.000000e+00 : f32
    %45 = vector.broadcast %cst_18 : f32 to vector<16x64xf32>
    %46 = arith.subf %45, %42 : vector<16x64xf32>
    %cst_19 = arith.constant 1.000000e+00 : f32
    %47 = vector.broadcast %cst_19 : f32 to vector<16x64xf32>
    %48 = arith.subf %42, %47 : vector<16x64xf32>
    %49 = arith.select %44, %46, %48 : vector<16x64xi1>, vector<16x64xf32>
    %cst_20 = arith.constant 1.000000e+00 : f32
    %50 = vector.broadcast %cst_20 : f32 to vector<16x64xf32>
    %51 = arith.addf %50, %49 : vector<16x64xf32>
    %52 = arith.mulf %11, %51 : vector<16x64xf32>
    %c0_21 = arith.constant 0 : index
    %c0_22 = arith.constant 0 : index
    %53 = vector.load %arg8[%c0_21, %c0_22] : memref<16x32xf32, #tpu.memory_space<vmem>>, vector<16x32xf32>
    %54 = arith.truncf %52 : vector<16x64xf32> to vector<16x64xbf16>
    %c0_23 = arith.constant 0 : index
    %c0_24 = arith.constant 0 : index
    %55 = vector.load %arg5[%c0_23, %c0_24] : memref<64x32xbf16, #tpu.memory_space<vmem>>, vector<64x32xbf16>
    %cst_25 = arith.constant dense<0.000000e+00> : vector<16x32xf32>
    %56 = tpu.matmul %54, %55, %cst_25 {dimension_numbers = #tpu.dot_dimension_numbers<[1], [0], [0], [1], [0, 0, 1, 1], [], []>} : vector<16x64xbf16>, vector<64x32xbf16>, vector<16x32xf32> -> vector<16x32xf32>
    %57 = arith.addf %53, %56 : vector<16x32xf32>
    %c0_26 = arith.constant 0 : index
    %c0_27 = arith.constant 0 : index
    %58 = vector.load %arg8[%c0_26, %c0_27] : memref<16x32xf32, #tpu.memory_space<vmem>>, vector<16x32xf32>
    tpu.vector_store %arg8[%c0_26, %c0_27], %57 {strides = array<i32>} : memref<16x32xf32, #tpu.memory_space<vmem>>, vector<16x32xf32>,
    %c0_i32_28 = arith.constant 0 : i32
    %59 = arith.cmpi eq, %arg1, %c0_i32_28 : i32
    %60 = arith.extui %59 : i1 to i32
    %c0_i32_29 = arith.constant 0 : i32
    %61 = arith.cmpi ne, %60, %c0_i32_29 : i32
    scf.if %61 {
      %c0_30 = arith.constant 0 : index
      %c0_31 = arith.constant 0 : index
      %62 = vector.load %arg8[%c0_30, %c0_31] : memref<16x32xf32, #tpu.memory_space<vmem>>, vector<16x32xf32>
      %c0_32 = arith.constant 0 : index
      %c0_33 = arith.constant 0 : index
      %63 = vector.load %arg6[%c0_32, %c0_33] : memref<1x32xf32, #tpu.memory_space<vmem>>, vector<1x32xf32>
      %64 = vector.broadcast %63 : vector<1x32xf32> to vector<16x32xf32>
      %65 = arith.addf %62, %64 : vector<16x32xf32>
      %c0_34 = arith.constant 0 : index
      %c0_35 = arith.constant 0 : index
      %66 = vector.load %arg7[%c0_34, %c0_35] : memref<16x32xf32, #tpu.memory_space<vmem>>, vector<16x32xf32>
      tpu.vector_store %arg7[%c0_34, %c0_35], %65 {strides = array<i32>} : memref<16x32xf32, #tpu.memory_space<vmem>>, vector<16x32xf32>,
    } else {
    }
    return
  }
  func.func @transform_0(%arg0: i32, %arg1: i32) -> (i32, i32) {
    %c0_i32 = arith.constant 0 : i32
    %c0_i32_0 = arith.constant 0 : i32
    return %arg0, %c0_i32 : i32, i32
  }
  func.func @transform_1(%arg0: i32, %arg1: i32) -> (i32, i32) {
    %c0_i32 = arith.constant 0 : i32
    %c0_i32_0 = arith.constant 0 : i32
    %c0_i32_1 = arith.constant 0 : i32
    return %c0_i32, %c0_i32_0 : i32, i32
  }
  func.func @transform_2(%arg0: i32, %arg1: i32) -> (i32, i32) {
    %c0_i32 = arith.constant 0 : i32
    %c0_i32_0 = arith.constant 0 : i32
    %c0_i32_1 = arith.constant 0 : i32
    return %c0_i32, %c0_i32_0 : i32, i32
  }
  func.func @transform_3(%arg0: i32, %arg1: i32) -> (i32, i32) {
    %c0_i32 = arith.constant 0 : i32
    %c0_i32_0 = arith.constant 0 : i32
    %c0_i32_1 = arith.constant 0 : i32
    return %c0_i32, %c0_i32_0 : i32, i32
  }
  func.func @transform_4(%arg0: i32, %arg1: i32) -> (i32, i32) {
    %c0_i32 = arith.constant 0 : i32
    %c0_i32_0 = arith.constant 0 : i32
    %c0_i32_1 = arith.constant 0 : i32
    return %c0_i32, %c0_i32_0 : i32, i32
  }
  func.func @transform_5(%arg0: i32, %arg1: i32) -> (i32, i32) {
    %c0_i32 = arith.constant 0 : i32
    %c0_i32_0 = arith.constant 0 : i32
    return %arg0, %c0_i32 : i32, i32
  }
}

module attributes {stable_mosaic.version = 11 : i64} {
  func.func @_mlp_kernel(%arg0: i32, %arg1: i32, %arg2: memref<16x32xf32, #tpu.memory_space<vmem>>, %arg3: memref<32x64xbf16, #tpu.memory_space<vmem>>, %arg4: memref<1x64xf32, #tpu.memory_space<vmem>>, %arg5: memref<64x32xbf16, #tpu.memory_space<vmem>>, %arg6: memref<1x32xf32, #tpu.memory_space<vmem>>, %arg7: memref<16x32xf32, #tpu.memory_space<vmem>>, %arg8: memref<16x32xf32, #tpu.memory_space<vmem>>) attributes {dimension_semantics = [#tpu.dimension_semantics<parallel>, #tpu.dimension_semantics<arbitrary>], iteration_bounds = array<i64: 1, 1>, scalar_prefetch = 0 : i64, scratch_operands = 1 : i64, tpu.core_type = #tpu.core_type<tc>, window_params = [{transform_indices = @transform_0, window_bounds = array<i64: 16, 32>}, {pipeline_mode = #tpu.pipeline_mode<synchronous>, transform_indices = @transform_1, window_bounds = array<i64: 32, 64>}, {pipeline_mode = #tpu.pipeline_mode<synchronous>, transform_indices = @transform_2, window_bounds = array<i64: 1, 64>}, {pipeline_mode = #tpu.pipeline_mode<synchronous>, transform_indices = @transform_3, window_bounds = array<i64: 64, 32>}, {pipeline_mode = #tpu.pipeline_mode<synchronous>, transform_indices = @transform_4, window_bounds = array<i64: 1, 32>}, {transform_indices = @transform_5, window_bounds = array<i64: 16, 32>}]} {
    %c0_i32 = arith.constant 0 : i32
    %0 = arith.cmpi eq, %arg1, %c0_i32 : i32
    %1 = arith.extui %0 : i1 to i32
    %c0_i32_0 = arith.constant 0 : i32
    %2 = arith.cmpi ne, %1, %c0_i32_0 : i32
    scf.if %2 {
      %cst_30 = arith.constant 0.000000e+00 : f32
      %62 = vector.broadcast %cst_30 : f32 to vector<16x32xf32>
      %c0_31 = arith.constant 0 : index
      %c0_32 = arith.constant 0 : index
      %63 = vector.load %arg8[%c0_31, %c0_32] : memref<16x32xf32, #tpu.memory_space<vmem>>, vector<16x32xf32>
      tpu.vector_store %arg8[%c0_31, %c0_32], %62 {strides = array<i32>} : memref<16x32xf32, #tpu.memory_space<vmem>>, vector<16x32xf32>,
    } else {
    }
    %c0 = arith.constant 0 : index
    %c0_1 = arith.constant 0 : index
    %3 = vector.load %arg2[%c0, %c0_1] : memref<16x32xf32, #tpu.memory_space<vmem>>, vector<16x32xf32>
    %4 = arith.truncf %3 : vector<16x32xf32> to vector<16x32xbf16>
    %c0_2 = arith.constant 0 : index
    %c0_3 = arith.constant 0 : index
    %5 = vector.load %arg3[%c0_2, %c0_3] : memref<32x64xbf16, #tpu.memory_space<vmem>>, vector<32x64xbf16>
    %cst = arith.constant dense<0.000000e+00> : vector<16x64xf32>
    %6 = tpu.matmul %4, %5, %cst {dimension_numbers = #tpu.dot_dimension_numbers<[1], [0], [0], [1], [0, 0, 1, 1], [], []>} : vector<16x32xbf16>, vector<32x64xbf16>, vector<16x64xf32> -> vector<16x64xf32>
    %c0_4 = arith.constant 0 : index
    %c0_5 = arith.constant 0 : index
    %7 = vector.load %arg4[%c0_4, %c0_5] : memref<1x64xf32, #tpu.memory_space<vmem>>, vector<1x64xf32>
    %8 = vector.broadcast %7 : vector<1x64xf32> to vector<16x64xf32>
    %9 = arith.addf %6, %8 : vector<16x64xf32>
    %cst_6 = arith.constant 5.000000e-01 : f32
    %10 = vector.broadcast %cst_6 : f32 to vector<16x64xf32>
    %11 = arith.mulf %10, %9 : vector<16x64xf32>
    %cst_7 = arith.constant 0.707106769 : f32
    %12 = vector.broadcast %cst_7 : f32 to vector<16x64xf32>
    %13 = arith.mulf %9, %12 : vector<16x64xf32>
    %14 = math.absf %13 : vector<16x64xf32>
    %cst_8 = arith.constant 0.327591091 : f32
    %15 = vector.broadcast %cst_8 : f32 to vector<16x64xf32>
    %16 = arith.mulf %15, %14 : vector<16x64xf32>
    %cst_9 = arith.constant 1.000000e+00 : f32
    %17 = vector.broadcast %cst_9 : f32 to vector<16x64xf32>
    %18 = arith.addf %17, %16 : vector<16x64xf32>
    %19 = tpu.reciprocal %18 {approx = true} : vector<16x64xf32> -> vector<16x64xf32>
    %20 = arith.mulf %18, %19 : vector<16x64xf32>
    %cst_10 = arith.constant 2.000000e+00 : f32
    %21 = vector.broadcast %cst_10 : f32 to vector<16x64xf32>
    %22 = arith.subf %21, %20 : vector<16x64xf32>
    %23 = arith.mulf %19, %22 : vector<16x64xf32>
    %cst_11 = arith.constant 1.06140542 : f32
    %24 = vector.broadcast %cst_11 : f32 to vector<16x64xf32>
    %25 = arith.mulf %24, %23 : vector<16x64xf32>
    %cst_12 = arith.constant -1.45315206 : f32
    %26 = vector.broadcast %cst_12 : f32 to vector<16x64xf32>
    %27 = arith.addf %25, %26 : vector<16x64xf32>
    %28 = arith.mulf %27, %23 : vector<16x64xf32>
    %cst_13 = arith.constant 1.42141378 : f32
    %29 = vector.broadcast %cst_13 : f32 to vector<16x64xf32>
    %30 = arith.addf %28, %29 : vector<16x64xf32>
    %31 = arith.mulf %30, %23 : vector<16x64xf32>
    %cst_14 = arith.constant -0.284496725 : f32
    %32 = vector.broadcast %cst_14 : f32 to vector<16x64xf32>
    %33 = arith.addf %31, %32 : vector<16x64xf32>
    %34 = arith.mulf %33, %23 : vector<16x64xf32>
    %cst_15 = arith.constant 0.254829586 : f32
    %35 = vector.broadcast %cst_15 : f32 to vector<16x64xf32>
    %36 = arith.addf %34, %35 : vector<16x64xf32>
    %37 = arith.mulf %36, %23 : vector<16x64xf32>
    %cst_16 = arith.constant 0.000000e+00 : f32
    %38 = vector.broadcast %cst_16 : f32 to vector<16x64xf32>
    %39 = arith.subf %38, %14 : vector<16x64xf32>
    %40 = arith.mulf %39, %14 : vector<16x64xf32>
    %41 = math.exp %40 : vector<16x64xf32>
    %42 = arith.mulf %37, %41 : vector<16x64xf32>
    %cst_17 = arith.constant 0.000000e+00 : f32
    %43 = vector.broadcast %cst_17 : f32 to vector<16x64xf32>
    %44 = arith.cmpf oge, %13, %43 : vector<16x64xf32>
    %cst_18 = arith.constant 1.000000e+00 : f32
    %45 = vector.broadcast %cst_18 : f32 to vector<16x64xf32>
    %46 = arith.subf %45, %42 : vector<16x64xf32>
    %cst_19 = arith.constant 1.000000e+00 : f32
    %47 = vector.broadcast %cst_19 : f32 to vector<16x64xf32>
    %48 = arith.subf %42, %47 : vector<16x64xf32>
    %49 = arith.select %44, %46, %48 : vector<16x64xi1>, vector<16x64xf32>
    %cst_20 = arith.constant 1.000000e+00 : f32
    %50 = vector.broadcast %cst_20 : f32 to vector<16x64xf32>
    %51 = arith.addf %50, %49 : vector<16x64xf32>
    %52 = arith.mulf %11, %51 : vector<16x64xf32>
    %c0_21 = arith.constant 0 : index
    %c0_22 = arith.constant 0 : index
    %53 = vector.load %arg8[%c0_21, %c0_22] : memref<16x32xf32, #tpu.memory_space<vmem>>, vector<16x32xf32>
    %54 = arith.truncf %52 : vector<16x64xf32> to vector<16x64xbf16>
    %c0_23 = arith.constant 0 : index
    %c0_24 = arith.constant 0 : index
    %55 = vector.load %arg5[%c0_23, %c0_24] : memref<64x32xbf16, #tpu.memory_space<vmem>>, vector<64x32xbf16>
    %cst_25 = arith.constant dense<0.000000e+00> : vector<16x32xf32>
    %56 = tpu.matmul %54, %55, %cst_25 {dimension_numbers = #tpu.dot_dimension_numbers<[1], [0], [0], [1], [0, 0, 1, 1], [], []>} : vector<16x64xbf16>, vector<64x32xbf16>, vector<16x32xf32> -> vector<16x32xf32>
    %57 = arith.addf %53, %56 : vector<16x32xf32>
    %c0_26 = arith.constant 0 : index
    %c0_27 = arith.constant 0 : index
    %58 = vector.load %arg8[%c0_26, %c0_27] : memref<16x32xf32, #tpu.memory_space<vmem>>, vector<16x32xf32>
    tpu.vector_store %arg8[%c0_26, %c0_27], %57 {strides = array<i32>} : memref<16x32xf32, #tpu.memory_space<vmem>>, vector<16x32xf32>,
    %c0_i32_28 = arith.constant 0 : i32
    %59 = arith.cmpi eq, %arg1, %c0_i32_28 : i32
    %60 = arith.extui %59 : i1 to i32
    %c0_i32_29 = arith.constant 0 : i32
    %61 = arith.cmpi ne, %60, %c0_i32_29 : i32
    scf.if %61 {
      %c0_30 = arith.constant 0 : index
      %c0_31 = arith.constant 0 : index
      %62 = vector.load %arg8[%c0_30, %c0_31] : memref<16x32xf32, #tpu.memory_space<vmem>>, vector<16x32xf32>
      %c0_32 = arith.constant 0 : index
      %c0_33 = arith.constant 0 : index
      %63 = vector.load %arg6[%c0_32, %c0_33] : memref<1x32xf32, #tpu.memory_space<vmem>>, vector<1x32xf32>
      %64 = vector.broadcast %63 : vector<1x32xf32> to vector<16x32xf32>
      %65 = arith.addf %62, %64 : vector<16x32xf32>
      %c0_34 = arith.constant 0 : index
      %c0_35 = arith.constant 0 : index
      %66 = vector.load %arg7[%c0_34, %c0_35] : memref<16x32xf32, #tpu.memory_space<vmem>>, vector<16x32xf32>
      tpu.vector_store %arg7[%c0_34, %c0_35], %65 {strides = array<i32>} : memref<16x32xf32, #tpu.memory_space<vmem>>, vector<16x32xf32>,
    } else {
    }
    return
  }
  func.func @transform_0(%arg0: i32, %arg1: i32) -> (i32, i32) {
    %c0_i32 = arith.constant 0 : i32
    %c0_i32_0 = arith.constant 0 : i32
    return %arg0, %c0_i32 : i32, i32
  }
  func.func @transform_1(%arg0: i32, %arg1: i32) -> (i32, i32) {
    %c0_i32 = arith.constant 0 : i32
    %c0_i32_0 = arith.constant 0 : i32
    %c0_i32_1 = arith.constant 0 : i32
    return %c0_i32, %c0_i32_0 : i32, i32
  }
  func.func @transform_2(%arg0: i32, %arg1: i32) -> (i32, i32) {
    %c0_i32 = arith.constant 0 : i32
    %c0_i32_0 = arith.constant 0 : i32
    %c0_i32_1 = arith.constant 0 : i32
    return %c0_i32, %c0_i32_0 : i32, i32
  }
  func.func @transform_3(%arg0: i32, %arg1: i32) -> (i32, i32) {
    %c0_i32 = arith.constant 0 : i32
    %c0_i32_0 = arith.constant 0 : i32
    %c0_i32_1 = arith.constant 0 : i32
    return %c0_i32, %c0_i32_0 : i32, i32
  }
  func.func @transform_4(%arg0: i32, %arg1: i32) -> (i32, i32) {
    %c0_i32 = arith.constant 0 : i32
    %c0_i32_0 = arith.constant 0 : i32
    %c0_i32_1 = arith.constant 0 : i32
    return %c0_i32, %c0_i32_0 : i32, i32
  }
  func.func @transform_5(%arg0: i32, %arg1: i32) -> (i32, i32) {
    %c0_i32 = arith.constant 0 : i32
    %c0_i32_0 = arith.constant 0 : i32
    return %arg0, %c0_i32 : i32, i32
  }
}

</mosaic_0001>

<bundles_post_ra>
// kernel: tpu_custom_call.1
= control target key start
LH: loop header
LB: loop body
LE: loop exit
PB: predicated region body
PF: predicated region fallthrough
CT: control target
= control target key end

     0   :  { %v357_v1 = vmov 0.0   ;;  %vm358_vm0 = vmmov 0   ;;  %vm26_vm1 = vcmask 261120   ;;  %s445_s0 = inlined_call_operand.vmem [shape: f32[16,32], index: 0, kind: input, shape index: {}]   ;;  %s446_s1 = inlined_call_operand.vmem [shape: bf16[32,64], index: 1, kind: input, shape index: {}]   ;;  %s447_s2 = inlined_call_operand.vmem [shape: f32[1,64], index: 2, kind: input, shape index: {}]   ;;  %s448_s3 = inlined_call_operand.vmem [shape: bf16[64,32], index: 3, kind: input, shape index: {}]   ;;  %s449_s4 = inlined_call_operand.vmem [shape: f32[1,32], index: 4, kind: input, shape index: {}]   ;;  %s450_s5 = inlined_call_operand.hbm [shape: f32[16,32], index: 5, kind: output, shape index: {}]  }
   0x1   :  { %v319_v0 = vld [vmem:[%s446_s1] sm:$0xff]   ;;  %294 = vmatprep.subr.bf16.mxu0 %v357_v1  ;;  %302 = vmatprep.subr.bf16.mxu1 %v357_v1  ;;  %v320_v2 = vld [vmem:[%s446_s1 + $0x8] sm:$0xff]   ;;  %27 = vst.msk [vmem:[#allocation2] sm:$0xff] %vm26_vm1, %v357_v1  ;;  %28 = vst.msk [vmem:[#allocation2 + $0x8] sm:$0xff] %vm26_vm1, %v357_v1 }
   0x2   :  { %295 = vmatpush3.bf16.msra.mxu0 %v319_v0  ;;  %298 = vmatprep.mubr.msk.bf16.mxu0 %vm358_vm0, %v357_v1  ;;  %v29_v3 = vld [vmem:[%s445_s0] sm:$0xff]  ;;  %v30_v4 = vld [vmem:[%s445_s0 + $0x8] sm:$0xff] }
   0x3   :  { %296 = vmatprep.subr.bf16.mxu0 %v357_v1  ;;  %310 = vmatprep.mubr.msk.bf16.mxu1 %vm358_vm0, %v357_v1  ;;  %v31_v5 = vpack.c.bf16 %v30_v4, %v29_v3 }
   0x4   :  { %10 = vsyncpa [#allocation4], 0  ;;  %v321_v6 = vld [vmem:[%s448_s3] sm:$0xff]   ;;  %v322_v7 = vld [vmem:[%s448_s3 + $0x8] sm:$0xff]   ;;  %vm193_vm4 = vcmask 523264   ;;  %s359_s9 = smov [#allocation3]  }
   0x5   :  { %303 = vmatpush3.bf16.msra.mxu1 %v321_v6  ;;  %v323_v8 = vld [vmem:[%s448_s3 + $0x10] sm:$0xff]   ;;  %v324_v9 = vld [vmem:[%s448_s3 + $0x18] sm:$0xff]   ;;  %v274_v10 = vld [vmem:[%s447_s2] ss:$0 sm:$0xff]  ;;  %s263_s10 = sshll.u32 %s359_s9, 4  ;;  %s264_s10 = int_to_ptr.vmem [resolvable:$true] %s263_s10 }
   0x6   :  { %297 = vmatpush3.bf16.msra.mxu0 %v320_v2  ;;  %304 = vmatprep.subr.bf16.mxu1 %v357_v1  ;;  %s333_s11 = scalar_lea.vmem %s264_s10, 256  ;;  %p338_p1 = scmp.lt.s32.totalorder %s264_s10, %s264_s10 }
   0x7   :  { %p334_p0 = scmp.ne.s32.totalorder %s264_s10, %s333_s11  ;;  %p339_p2 = scmp.lt.s32.totalorder %s333_s11, %s333_s11 }
   0x9   :  { %299 = vmatmul.mubr.msk.bf16.vlgmr.msra.gmra.mrb[0].mxu0 %vm26_vm1, %v31_v5  ;;  %305 = vmatpush3.bf16.msra.mxu1 %v322_v7  ;;  %p340_p3 = por %p339_p2, %p338_p1 }
   0xa   :  { %306 = vmatprep.subr.bf16.mxu1 %v357_v1 }
   0xb   :  { %p341_p4 = pnand %p340_p3, %p334_p0 }
   0xd   :  { %307 = vmatpush3.bf16.msra.mxu1 %v323_v8 }
   0xe   :  { %308 = vmatprep.subr.bf16.mxu1 %v357_v1 }
  0x11   :  { %309 = vmatpush3.bf16.msra.mxu1 %v324_v9 }
  0xdc   :  { %v93_v11 = vpop.f32.mrb[0].mxu0 }
  0xdd   :  { %v422_v12 = vadd.f32 %v274_v10, %v93_v11  ;;  %v300_v13 = vpop.f32.mrb[1].mxu0 }
  0xde   :  { %v96_v14 = vpop.f32.mrb[2].mxu0  ;;  %v159_v13 = vld [vmem:[#allocation2 + $0x8] sm:$0xff] }
  0xdf   :  { %v102_v15 = vmul.f32 0.70710677, %v422_v12  ;;  %v97_v16 = vadd.f32 %v274_v10, %v96_v14  ;;  %v301_v17 = vpop.f32.mrb[3].mxu0  ;;  %v100_v4 = vmul.f32 0.5, %v422_v12  ;;  %v158_v10 = vld [vmem:[#allocation2] sm:$0xff] }
  0xe0   :  { %v285_v12 = vld [vmem:[%s449_s4] ss:$0 sm:$0xff] }
  0xe1   :  { %v104_v18 = vand.u32 2147483647, %v102_v15  ;;  %v103_v19 = vmul.f32 0.70710677, %v97_v16  ;;  %vm146_vm2 = vcmp.ge.f32.partialorder %v102_v15, 0.0  ;;  %v101_v5 = vmul.f32 0.5, %v97_v16 }
  0xe3   :  { %v106_v20 = vmul.f32 0.3275911, %v104_v18  ;;  %v105_v21 = vand.u32 2147483647, %v103_v19  ;;  %v136_v27 = vsub.f32 0.0, %v104_v18  ;;  %vm147_vm3 = vcmp.ge.f32.partialorder %v103_v19, 0.0 }
  0xe5   :  { %v108_v22 = vadd.f32 1.0, %v106_v20  ;;  %v107_v23 = vmul.f32 0.3275911, %v105_v21  ;;  %v137_v32 = vsub.f32 0.0, %v105_v21  ;;  %v138_v33 = vmul.f32 %v136_v27, %v104_v18 }
  0xe7   :  { %325 = vrcp.f32 %v108_v22  ;;  %v109_v24 = vadd.f32 1.0, %v107_v23  ;;  %v139_v38 = vmul.f32 %v137_v32, %v105_v21  ;;  %v140_v39 = vmul.f32 1.442695, %v138_v33 }
  0xe9   :  { %327 = vrcp.f32 %v109_v24  ;;  %v142_v44 = vmul.f32 1.442695, %v139_v38 }
  0xea   :  { %329 = vpow2.f32 %v140_v39 }
  0xeb   :  { %331 = vpow2.f32 %v142_v44 }
  0xf1   :  { %v326_v25 = vpop.eup %325 }
  0xf2   :  { %v112_v26 = vmul.f32 %v326_v25, %v108_v22 }
  0xf3   :  { %v328_v28 = vpop.eup %327 }
  0xf4   :  { %v114_v29 = vsub.f32 2.0, %v112_v26  ;;  %v113_v30 = vmul.f32 %v328_v28, %v109_v24  ;;  %v330_v55 = vpop.eup %329 }
  0xf5   :  { %v332_v59 = vpop.eup %331 }
  0xf6   :  { %v116_v31 = vmul.f32 %v326_v25, %v114_v29  ;;  %v115_v34 = vsub.f32 2.0, %v113_v30 }
  0xf8   :  { %v118_v35 = vmul.f32 1.0614054, %v116_v31  ;;  %v117_v36 = vmul.f32 %v328_v28, %v115_v34 }
  0xfa   :  { %v120_v37 = vadd.f32 -1.4531521, %v118_v35  ;;  %v119_v40 = vmul.f32 1.0614054, %v117_v36 }
  0xfc   :  { %v122_v41 = vmul.f32 %v120_v37, %v116_v31  ;;  %v121_v42 = vadd.f32 -1.4531521, %v119_v40 }
  0xfe   :  { %v124_v43 = vadd.f32 1.4214138, %v122_v41  ;;  %v123_v45 = vmul.f32 %v121_v42, %v117_v36 }
 0x100   :  { %v126_v46 = vmul.f32 %v124_v43, %v116_v31  ;;  %v125_v47 = vadd.f32 1.4214138, %v123_v45 }
 0x102   :  { %v128_v48 = vadd.f32 -0.28449672, %v126_v46  ;;  %v127_v49 = vmul.f32 %v125_v47, %v117_v36 }
 0x104   :  { %v130_v50 = vmul.f32 %v128_v48, %v116_v31  ;;  %v129_v51 = vadd.f32 -0.28449672, %v127_v49 }
 0x106   :  { %v132_v52 = vadd.f32 0.2548296, %v130_v50  ;;  %v131_v53 = vmul.f32 %v129_v51, %v117_v36 }
 0x108   :  { %v134_v54 = vmul.f32 %v132_v52, %v116_v31  ;;  %v133_v56 = vadd.f32 0.2548296, %v131_v53 }
 0x10a   :  { %v144_v57 = vmul.f32 %v330_v55, %v134_v54  ;;  %v135_v58 = vmul.f32 %v133_v56, %v117_v36 }
 0x10c   :  { %v148_v60 = vsub.f32 1.0, %v144_v57  ;;  %v278_v61 = vadd.f32 -1.0, %v144_v57  ;;  %v145_v62 = vmul.f32 %v332_v59, %v135_v58 }
 0x10e   :  { %v152_v63 = vsel %vm146_vm2, %v148_v60, %v278_v61  ;;  %v149_v0 = vsub.f32 1.0, %v145_v62  ;;  %v279_v1 = vadd.f32 -1.0, %v145_v62 }
 0x10f   :  { %v154_v2 = vadd.f32 1.0, %v152_v63 }
 0x110   :  { %v153_v3 = vsel %vm147_vm3, %v149_v0, %v279_v1 }
 0x111   :  { %v155_v6 = vadd.f32 1.0, %v153_v3  ;;  %v156_v7 = vmul.f32 %v154_v2, %v100_v4 }
 0x113   :  { %v157_v8 = vmul.f32 %v155_v6, %v101_v5 }
 0x115   :  { %v160_v9 = vpack.c.bf16 %v157_v8, %v156_v7 }
 0x117   :  { %311 = vmatmul.mubr.msk.bf16.vlgmr.msra.gmra.mrb[0].mxu1 %vm193_vm4, %v160_v9 }
 0x1ea   :  { %v231_v11 = vpop.f32.mrb[0].mxu1 }
 0x1eb   :  { %v238_v14 = vadd.f32 %v231_v11, %v158_v10  ;;  %v312_v15 = vpop.f32.mrb[1].mxu1 }
 0x1ec   :  { %v234_v17 = vpop.f32.mrb[2].mxu1 }
 0x1ed   :  { %240 = vst.msk [vmem:[#allocation2] sm:$0xff] %vm26_vm1, %v238_v14  ;;  %v239_v18 = vadd.f32 %v234_v17, %v159_v13  ;;  %v313_v19 = vpop.f32.mrb[3].mxu1 }
 0x1ef   :  { %241 = vst.msk [vmem:[#allocation2 + $0x8] sm:$0xff] %vm26_vm1, %v239_v18 }
 0x1f4   :  { %v245_v16 = vld [vmem:[#allocation2] sm:$0xff] }
 0x1f5   :  { %v254_v20 = vadd.f32 %v285_v12, %v245_v16 }
 0x1f6   :  { %v246_v21 = vld [vmem:[#allocation2 + $0x8] sm:$0xff] }
 0x1f7   :  { %v255_v22 = vadd.f32 %v285_v12, %v246_v21  ;;  %256 = vst.msk [vmem:[#allocation3] sm:$0xff] %vm26_vm1, %v254_v20 }
 0x1f9   :  { %257 = vst.msk [vmem:[#allocation3 + $0x8] sm:$0xff] %vm26_vm1, %v255_v22 }
 0x1fa   :  { %344 = shalt.err (!%p341_p4)
}
 0x1fb   :  { %s345_s13 = scalar_lea.hbm %s450_s5, 256 }
 0x1fc   :  { %p346_p5 = scmp.ne.s32.totalorder %s450_s5, %s345_s13  ;;  %p349_p6 = scmp.lt.u32.totalorder %s345_s13, %s450_s5 }
 0x1fe   :  { %p351_p7 = pnand %p349_p6, %p346_p5 }
 0x200   :  { %354 = shalt.err (!%p351_p7)
}
 0x201   :  { %s360_s18 = smov 128   ;;  %s361_s19 = smov 8  }
 0x202   :  { %269 = dma.vmem_to_hbm [thread:$0]  %s264_s10, 256, %s450_s5, [#allocation4], %s360_s18, %s360_s18, %s361_s19  }
 0x203   :  { %355 = dma.done.wait [#allocation4], 256  }
 0x204   :  { %356 = vsyncadd [#allocation4], 4294967040 }
 0x205   :  { %273 = vsyncpa [#allocation4], 1 }

// kernel: tpu_custom_call.1
= control target key start
LH: loop header
LB: loop body
LE: loop exit
PB: predicated region body
PF: predicated region fallthrough
CT: control target
= control target key end

     0   :  { %v357_v1 = vmov 0.0   ;;  %vm358_vm0 = vmmov 0   ;;  %vm26_vm1 = vcmask 261120   ;;  %s445_s0 = inlined_call_operand.vmem [shape: f32[16,32], index: 0, kind: input, shape index: {}]   ;;  %s446_s1 = inlined_call_operand.vmem [shape: bf16[32,64], index: 1, kind: input, shape index: {}]   ;;  %s447_s2 = inlined_call_operand.vmem [shape: f32[1,64], index: 2, kind: input, shape index: {}]   ;;  %s448_s3 = inlined_call_operand.vmem [shape: bf16[64,32], index: 3, kind: input, shape index: {}]   ;;  %s449_s4 = inlined_call_operand.vmem [shape: f32[1,32], index: 4, kind: input, shape index: {}]   ;;  %s450_s5 = inlined_call_operand.hbm [shape: f32[16,32], index: 5, kind: output, shape index: {}]  }
   0x1   :  { %v319_v0 = vld [vmem:[%s446_s1] sm:$0xff]   ;;  %294 = vmatprep.subr.bf16.mxu0 %v357_v1  ;;  %302 = vmatprep.subr.bf16.mxu1 %v357_v1  ;;  %v320_v2 = vld [vmem:[%s446_s1 + $0x8] sm:$0xff]   ;;  %27 = vst.msk [vmem:[#allocation2] sm:$0xff] %vm26_vm1, %v357_v1  ;;  %28 = vst.msk [vmem:[#allocation2 + $0x8] sm:$0xff] %vm26_vm1, %v357_v1 }
   0x2   :  { %295 = vmatpush3.bf16.msra.mxu0 %v319_v0  ;;  %298 = vmatprep.mubr.msk.bf16.mxu0 %vm358_vm0, %v357_v1  ;;  %v29_v3 = vld [vmem:[%s445_s0] sm:$0xff]  ;;  %v30_v4 = vld [vmem:[%s445_s0 + $0x8] sm:$0xff] }
   0x3   :  { %296 = vmatprep.subr.bf16.mxu0 %v357_v1  ;;  %310 = vmatprep.mubr.msk.bf16.mxu1 %vm358_vm0, %v357_v1  ;;  %v31_v5 = vpack.c.bf16 %v30_v4, %v29_v3 }
   0x4   :  { %10 = vsyncpa [#allocation4], 0  ;;  %v321_v6 = vld [vmem:[%s448_s3] sm:$0xff]   ;;  %v322_v7 = vld [vmem:[%s448_s3 + $0x8] sm:$0xff]   ;;  %vm193_vm4 = vcmask 523264   ;;  %s359_s9 = smov [#allocation3]  }
   0x5   :  { %303 = vmatpush3.bf16.msra.mxu1 %v321_v6  ;;  %v323_v8 = vld [vmem:[%s448_s3 + $0x10] sm:$0xff]   ;;  %v324_v9 = vld [vmem:[%s448_s3 + $0x18] sm:$0xff]   ;;  %v274_v10 = vld [vmem:[%s447_s2] ss:$0 sm:$0xff]  ;;  %s263_s10 = sshll.u32 %s359_s9, 4  ;;  %s264_s10 = int_to_ptr.vmem [resolvable:$true] %s263_s10 }
   0x6   :  { %297 = vmatpush3.bf16.msra.mxu0 %v320_v2  ;;  %304 = vmatprep.subr.bf16.mxu1 %v357_v1  ;;  %s333_s11 = scalar_lea.vmem %s264_s10, 256  ;;  %p338_p1 = scmp.lt.s32.totalorder %s264_s10, %s264_s10 }
   0x7   :  { %p334_p0 = scmp.ne.s32.totalorder %s264_s10, %s333_s11  ;;  %p339_p2 = scmp.lt.s32.totalorder %s333_s11, %s333_s11 }
   0x9   :  { %299 = vmatmul.mubr.msk.bf16.vlgmr.msra.gmra.mrb[0].mxu0 %vm26_vm1, %v31_v5  ;;  %305 = vmatpush3.bf16.msra.mxu1 %v322_v7  ;;  %p340_p3 = por %p339_p2, %p338_p1 }
   0xa   :  { %306 = vmatprep.subr.bf16.mxu1 %v357_v1 }
   0xb   :  { %p341_p4 = pnand %p340_p3, %p334_p0 }
   0xd   :  { %307 = vmatpush3.bf16.msra.mxu1 %v323_v8 }
   0xe   :  { %308 = vmatprep.subr.bf16.mxu1 %v357_v1 }
  0x11   :  { %309 = vmatpush3.bf16.msra.mxu1 %v324_v9 }
  0xdc   :  { %v93_v11 = vpop.f32.mrb[0].mxu0 }
  0xdd   :  { %v422_v12 = vadd.f32 %v274_v10, %v93_v11  ;;  %v300_v13 = vpop.f32.mrb[1].mxu0 }
  0xde   :  { %v96_v14 = vpop.f32.mrb[2].mxu0  ;;  %v159_v13 = vld [vmem:[#allocation2 + $0x8] sm:$0xff] }
  0xdf   :  { %v102_v15 = vmul.f32 0.70710677, %v422_v12  ;;  %v97_v16 = vadd.f32 %v274_v10, %v96_v14  ;;  %v301_v17 = vpop.f32.mrb[3].mxu0  ;;  %v100_v4 = vmul.f32 0.5, %v422_v12  ;;  %v158_v10 = vld [vmem:[#allocation2] sm:$0xff] }
  0xe0   :  { %v285_v12 = vld [vmem:[%s449_s4] ss:$0 sm:$0xff] }
  0xe1   :  { %v104_v18 = vand.u32 2147483647, %v102_v15  ;;  %v103_v19 = vmul.f32 0.70710677, %v97_v16  ;;  %vm146_vm2 = vcmp.ge.f32.partialorder %v102_v15, 0.0  ;;  %v101_v5 = vmul.f32 0.5, %v97_v16 }
  0xe3   :  { %v106_v20 = vmul.f32 0.3275911, %v104_v18  ;;  %v105_v21 = vand.u32 2147483647, %v103_v19  ;;  %v136_v27 = vsub.f32 0.0, %v104_v18  ;;  %vm147_vm3 = vcmp.ge.f32.partialorder %v103_v19, 0.0 }
  0xe5   :  { %v108_v22 = vadd.f32 1.0, %v106_v20  ;;  %v107_v23 = vmul.f32 0.3275911, %v105_v21  ;;  %v137_v32 = vsub.f32 0.0, %v105_v21  ;;  %v138_v33 = vmul.f32 %v136_v27, %v104_v18 }
  0xe7   :  { %325 = vrcp.f32 %v108_v22  ;;  %v109_v24 = vadd.f32 1.0, %v107_v23  ;;  %v139_v38 = vmul.f32 %v137_v32, %v105_v21  ;;  %v140_v39 = vmul.f32 1.442695, %v138_v33 }
  0xe9   :  { %327 = vrcp.f32 %v109_v24  ;;  %v142_v44 = vmul.f32 1.442695, %v139_v38 }
  0xea   :  { %329 = vpow2.f32 %v140_v39 }
  0xeb   :  { %331 = vpow2.f32 %v142_v44 }
  0xf1   :  { %v326_v25 = vpop.eup %325 }
  0xf2   :  { %v112_v26 = vmul.f32 %v326_v25, %v108_v22 }
  0xf3   :  { %v328_v28 = vpop.eup %327 }
  0xf4   :  { %v114_v29 = vsub.f32 2.0, %v112_v26  ;;  %v113_v30 = vmul.f32 %v328_v28, %v109_v24  ;;  %v330_v55 = vpop.eup %329 }
  0xf5   :  { %v332_v59 = vpop.eup %331 }
  0xf6   :  { %v116_v31 = vmul.f32 %v326_v25, %v114_v29  ;;  %v115_v34 = vsub.f32 2.0, %v113_v30 }
  0xf8   :  { %v118_v35 = vmul.f32 1.0614054, %v116_v31  ;;  %v117_v36 = vmul.f32 %v328_v28, %v115_v34 }
  0xfa   :  { %v120_v37 = vadd.f32 -1.4531521, %v118_v35  ;;  %v119_v40 = vmul.f32 1.0614054, %v117_v36 }
  0xfc   :  { %v122_v41 = vmul.f32 %v120_v37, %v116_v31  ;;  %v121_v42 = vadd.f32 -1.4531521, %v119_v40 }
  0xfe   :  { %v124_v43 = vadd.f32 1.4214138, %v122_v41  ;;  %v123_v45 = vmul.f32 %v121_v42, %v117_v36 }
 0x100   :  { %v126_v46 = vmul.f32 %v124_v43, %v116_v31  ;;  %v125_v47 = vadd.f32 1.4214138, %v123_v45 }
 0x102   :  { %v128_v48 = vadd.f32 -0.28449672, %v126_v46  ;;  %v127_v49 = vmul.f32 %v125_v47, %v117_v36 }
 0x104   :  { %v130_v50 = vmul.f32 %v128_v48, %v116_v31  ;;  %v129_v51 = vadd.f32 -0.28449672, %v127_v49 }
 0x106   :  { %v132_v52 = vadd.f32 0.2548296, %v130_v50  ;;  %v131_v53 = vmul.f32 %v129_v51, %v117_v36 }
 0x108   :  { %v134_v54 = vmul.f32 %v132_v52, %v116_v31  ;;  %v133_v56 = vadd.f32 0.2548296, %v131_v53 }
 0x10a   :  { %v144_v57 = vmul.f32 %v330_v55, %v134_v54  ;;  %v135_v58 = vmul.f32 %v133_v56, %v117_v36 }
 0x10c   :  { %v148_v60 = vsub.f32 1.0, %v144_v57  ;;  %v278_v61 = vadd.f32 -1.0, %v144_v57  ;;  %v145_v62 = vmul.f32 %v332_v59, %v135_v58 }
 0x10e   :  { %v152_v63 = vsel %vm146_vm2, %v148_v60, %v278_v61  ;;  %v149_v0 = vsub.f32 1.0, %v145_v62  ;;  %v279_v1 = vadd.f32 -1.0, %v145_v62 }
 0x10f   :  { %v154_v2 = vadd.f32 1.0, %v152_v63 }
 0x110   :  { %v153_v3 = vsel %vm147_vm3, %v149_v0, %v279_v1 }
 0x111   :  { %v155_v6 = vadd.f32 1.0, %v153_v3  ;;  %v156_v7 = vmul.f32 %v154_v2, %v100_v4 }
 0x113   :  { %v157_v8 = vmul.f32 %v155_v6, %v101_v5 }
 0x115   :  { %v160_v9 = vpack.c.bf16 %v157_v8, %v156_v7 }
 0x117   :  { %311 = vmatmul.mubr.msk.bf16.vlgmr.msra.gmra.mrb[0].mxu1 %vm193_vm4, %v160_v9 }
 0x1ea   :  { %v231_v11 = vpop.f32.mrb[0].mxu1 }
 0x1eb   :  { %v238_v14 = vadd.f32 %v231_v11, %v158_v10  ;;  %v312_v15 = vpop.f32.mrb[1].mxu1 }
 0x1ec   :  { %v234_v17 = vpop.f32.mrb[2].mxu1 }
 0x1ed   :  { %240 = vst.msk [vmem:[#allocation2] sm:$0xff] %vm26_vm1, %v238_v14  ;;  %v239_v18 = vadd.f32 %v234_v17, %v159_v13  ;;  %v313_v19 = vpop.f32.mrb[3].mxu1 }
 0x1ef   :  { %241 = vst.msk [vmem:[#allocation2 + $0x8] sm:$0xff] %vm26_vm1, %v239_v18 }
 0x1f4   :  { %v245_v16 = vld [vmem:[#allocation2] sm:$0xff] }
 0x1f5   :  { %v254_v20 = vadd.f32 %v285_v12, %v245_v16 }
 0x1f6   :  { %v246_v21 = vld [vmem:[#allocation2 + $0x8] sm:$0xff] }
 0x1f7   :  { %v255_v22 = vadd.f32 %v285_v12, %v246_v21  ;;  %256 = vst.msk [vmem:[#allocation3] sm:$0xff] %vm26_vm1, %v254_v20 }
 0x1f9   :  { %257 = vst.msk [vmem:[#allocation3 + $0x8] sm:$0xff] %vm26_vm1, %v255_v22 }
 0x1fa   :  { %344 = shalt.err (!%p341_p4)
}
 0x1fb   :  { %s345_s13 = scalar_lea.hbm %s450_s5, 256 }
 0x1fc   :  { %p346_p5 = scmp.ne.s32.totalorder %s450_s5, %s345_s13  ;;  %p349_p6 = scmp.lt.u32.totalorder %s345_s13, %s450_s5 }
 0x1fe   :  { %p351_p7 = pnand %p349_p6, %p346_p5 }
 0x200   :  { %354 = shalt.err (!%p351_p7)
}
 0x201   :  { %s360_s18 = smov 128   ;;  %s361_s19 = smov 8  }
 0x202   :  { %269 = dma.vmem_to_hbm [thread:$0]  %s264_s10, 256, %s450_s5, [#allocation4], %s360_s18, %s360_s18, %s361_s19  }
 0x203   :  { %355 = dma.done.wait [#allocation4], 256  }
 0x204   :  { %356 = vsyncadd [#allocation4], 4294967040 }
 0x205   :  { %273 = vsyncpa [#allocation4], 1 }

</bundles_post_ra>
